<compile_context>
chip_gen: v7x
topology: tpu7x:2x2x1
jax: 0.10.0
libtpu: 0.0.40
codegen_flags: <defaults>
</compile_context>

<pallas_src>
import jax
import jax.numpy as jnp
from jax.experimental import pallas as pl
from jax.experimental.pallas import tpu as pltpu

_NEG = jnp.float32(-1e30)  # "minus infinity" bias for padded action lanes


def policy_kernel(x_ref, w1_ref, w2_ref, b2_ref, o_ref):
    # x: [Bt, INp] (compute dtype), w1: [INp, H], w2: [H, Ap], b2: [1, Ap] f32.
    # b1 is folded into w1 via the all-ones column of x.
    h = jnp.dot(x_ref[...], w1_ref[...], preferred_element_type=jnp.float32)
    h = jnp.maximum(h, 0.0)                                        # ReLU (f32)
    logits = jnp.dot(h.astype(w2_ref.dtype), w2_ref[...],
                     preferred_element_type=jnp.float32) + b2_ref[...]
    # Numerically stable softmax over the lane-dense padded action axis.
    # Padded lanes carry -1e30 -> exp(...) == 0, so they contribute nothing.
    m = jnp.max(logits, axis=-1, keepdims=True)
    e = jnp.exp(logits - m)
    s = jnp.sum(e, axis=-1, keepdims=True)
    o_ref[...] = (e / s).astype(o_ref.dtype)      # exact divide: rows sum to 1


def _round_up(n, m):
    return ((n + m - 1) // m) * m


def _pad_to(a, shape, value=0.0):
    pads = [(0, t - s) for s, t in zip(a.shape, shape)]
    return jnp.pad(a, pads, constant_values=value)


def prepare_params(w1, b1, w2, b2, *, compute_dtype=jnp.bfloat16):
    """One-time weight prep (transpose, pad, fold b1, cast). Do NOT call per step.

    w1: [128, 18], b1: [128], w2: [A, 128], b2: [A]  (PyTorch nn.Linear layout)
    """
    hidden, in_dim = w1.shape
    A = w2.shape[0]
    in_pad = _round_up(in_dim + 1, 8)    # +1 column carries the folded b1
    A_pad = _round_up(A, 128)            # lane-dense output

    w1_p = jnp.zeros((in_pad, hidden), jnp.float32)
    w1_p = w1_p.at[:in_dim, :].set(w1.T.astype(jnp.float32))
    w1_p = w1_p.at[in_dim, :].set(b1.astype(jnp.float32))       # bias row
    w2_p = _pad_to(w2.T.astype(jnp.float32), (hidden, A_pad))   # [H, Ap]
    b2_p = _pad_to(b2.reshape(1, A).astype(jnp.float32), (1, A_pad), value=_NEG)

    return {
        "w1": w1_p.astype(compute_dtype),
        "w2": w2_p.astype(compute_dtype),
        "b2": b2_p,                       # stays f32 (holds the -1e30 mask)
        "in_dim": in_dim, "in_pad": in_pad,
        "A": A, "A_pad": A_pad, "hidden": hidden,
        "compute_dtype": compute_dtype,
    }


def policy_net_forward(x, params, *, block_rows=512, out_dtype=jnp.float32):
    """Forward pass: x [B, 18] -> softmax probabilities [B, A].

    block_rows: batch rows per grid tile (multiple of 8; use >=512 at rollout
    scale, keep <= ~4096 on v7x). out_dtype=jnp.bfloat16 halves write traffic.
    """
    B = x.shape[0]
    in_dim, in_pad = params["in_dim"], params["in_pad"]
    A, A_pad, hidden = params["A"], params["A_pad"], params["hidden"]
    cdt = params["compute_dtype"]

    Bt = _round_up(min(block_rows, _round_up(B, 8)), 8)
    B_pad = _round_up(B, Bt)
    n_tiles = B_pad // Bt

    # Zero-pad batch + input dim, set the bias column to 1.0 (folds b1).
    x_p = jnp.zeros((B_pad, in_pad), jnp.float32)
    x_p = x_p.at[:B, :in_dim].set(x.astype(jnp.float32))
    x_p = x_p.at[:, in_dim].set(1.0)
    x_p = x_p.astype(cdt)

    out_p = pl.pallas_call(
        policy_kernel,
        out_shape=jax.ShapeDtypeStruct((B_pad, A_pad), out_dtype),
        grid=(n_tiles,),
        in_specs=[
            pl.BlockSpec((Bt, in_pad), lambda i: (i, 0)),        # batch tile
            pl.BlockSpec((in_pad, hidden), lambda i: (0, 0)),    # VMEM-resident
            pl.BlockSpec((hidden, A_pad), lambda i: (0, 0)),     # VMEM-resident
            pl.BlockSpec((1, A_pad), lambda i: (0, 0)),          # VMEM-resident
        ],
        out_specs=pl.BlockSpec((Bt, A_pad), lambda i: (i, 0)),
        compiler_params=pltpu.CompilerParams(
            dimension_semantics=("parallel",)),
    )(x_p, params["w1"], params["w2"], params["b2"])

    return out_p[:B, :A]


if __name__ == "__main__":
    IN_DIM = 18
    HIDDEN = 128
    ACTION_SIZE = 4
    BATCH = 2

    key = jax.random.PRNGKey(0)
    k_x, k_w1, k_b1, k_w2, k_b2 = jax.random.split(key, 5)

    # Deterministic synthetic parameters (PyTorch-style uniform fan-in init).
    bound1 = 1.0 / jnp.sqrt(IN_DIM)
    bound2 = 1.0 / jnp.sqrt(HIDDEN)
    w1 = jax.random.uniform(k_w1, (HIDDEN, IN_DIM), jnp.float32, -bound1, bound1)
    b1 = jax.random.uniform(k_b1, (HIDDEN,), jnp.float32, -bound1, bound1)
    w2 = jax.random.uniform(k_w2, (ACTION_SIZE, HIDDEN), jnp.float32, -bound2, bound2)
    b2 = jax.random.uniform(k_b2, (ACTION_SIZE,), jnp.float32, -bound2, bound2)

    x = jax.random.normal(k_x, (BATCH, IN_DIM), jnp.float32)

    # Hot path: prepare once, then call forward per step / per rollout batch.
    params = prepare_params(w1, b1, w2, b2)          # bf16 MXU inputs
    out = jax.block_until_ready(policy_net_forward(x, params))

    # Reference check in plain JAX (f32 end-to-end).
    h_ref = jnp.maximum(x @ w1.T + b1, 0.0)
    ref = jax.nn.softmax(h_ref @ w2.T + b2, axis=1)

    assert out.shape == (BATCH, ACTION_SIZE)
    # Loose tolerance for the bf16 matmul inputs (f32 accumulation + softmax).
    assert jnp.allclose(out, ref, atol=1e-2, rtol=1e-2)
    # Exact divide -> rows sum to 1 within f32 rounding.
    assert jnp.allclose(jnp.sum(out, axis=1), 1.0, atol=1e-4)
    assert bool(jnp.all(out >= 0.0))

    print("KERNEL_OK")
</pallas_src>

<mosaic_0001>
module attributes {stable_mosaic.version = 11 : i64} {
  func.func @policy_kernel(%arg0: i32, %arg1: memref<8x24xbf16, #tpu.memory_space<vmem>>, %arg2: memref<24x128xbf16, #tpu.memory_space<vmem>>, %arg3: memref<128x128xbf16, #tpu.memory_space<vmem>>, %arg4: memref<1x128xf32, #tpu.memory_space<vmem>>, %arg5: memref<8x128xf32, #tpu.memory_space<vmem>>) attributes {dimension_semantics = [#tpu.dimension_semantics<parallel>], iteration_bounds = array<i64: 1>, scalar_prefetch = 0 : i64, scratch_operands = 0 : i64, tpu.core_type = #tpu.core_type<tc>, window_params = [{transform_indices = @transform_0, window_bounds = array<i64: 8, 24>}, {pipeline_mode = #tpu.pipeline_mode<synchronous>, transform_indices = @transform_1, window_bounds = array<i64: 24, 128>}, {pipeline_mode = #tpu.pipeline_mode<synchronous>, transform_indices = @transform_2, window_bounds = array<i64: 128, 128>}, {pipeline_mode = #tpu.pipeline_mode<synchronous>, transform_indices = @transform_3, window_bounds = array<i64: 1, 128>}, {transform_indices = @transform_4, window_bounds = array<i64: 8, 128>}]} {
    %c0 = arith.constant 0 : index
    %c0_0 = arith.constant 0 : index
    %0 = vector.load %arg1[%c0, %c0_0] : memref<8x24xbf16, #tpu.memory_space<vmem>>, vector<8x24xbf16>
    %c0_1 = arith.constant 0 : index
    %c0_2 = arith.constant 0 : index
    %1 = vector.load %arg2[%c0_1, %c0_2] : memref<24x128xbf16, #tpu.memory_space<vmem>>, vector<24x128xbf16>
    %cst = arith.constant dense<0.000000e+00> : vector<8x128xf32>
    %2 = tpu.matmul %0, %1, %cst {dimension_numbers = #tpu.dot_dimension_numbers<[1], [0], [0], [1], [0, 0, 1, 1], [], []>} : vector<8x24xbf16>, vector<24x128xbf16>, vector<8x128xf32> -> vector<8x128xf32>
    %cst_3 = arith.constant 0.000000e+00 : f32
    %3 = vector.broadcast %cst_3 : f32 to vector<8x128xf32>
    %4 = arith.maximumf %2, %3 : vector<8x128xf32>
    %5 = arith.truncf %4 : vector<8x128xf32> to vector<8x128xbf16>
    %c0_4 = arith.constant 0 : index
    %c0_5 = arith.constant 0 : index
    %6 = vector.load %arg3[%c0_4, %c0_5] : memref<128x128xbf16, #tpu.memory_space<vmem>>, vector<128x128xbf16>
    %cst_6 = arith.constant dense<0.000000e+00> : vector<8x128xf32>
    %7 = tpu.matmul %5, %6, %cst_6 {dimension_numbers = #tpu.dot_dimension_numbers<[1], [0], [0], [1], [0, 0, 1, 1], [], []>} : vector<8x128xbf16>, vector<128x128xbf16>, vector<8x128xf32> -> vector<8x128xf32>
    %c0_7 = arith.constant 0 : index
    %c0_8 = arith.constant 0 : index
    %8 = vector.load %arg4[%c0_7, %c0_8] : memref<1x128xf32, #tpu.memory_space<vmem>>, vector<1x128xf32>
    %9 = vector.broadcast %8 : vector<1x128xf32> to vector<8x128xf32>
    %10 = arith.addf %7, %9 : vector<8x128xf32>
    %cst_9 = arith.constant dense<0xFF800000> : vector<8xf32>
    %11 = vector.multi_reduction <maximumf>, %10, %cst_9 [1] : vector<8x128xf32> to vector<8xf32>
    %12 = vector.shape_cast %11 : vector<8xf32> to vector<8x1xf32>
    %13 = vector.broadcast %12 : vector<8x1xf32> to vector<8x128xf32>
    %14 = arith.subf %10, %13 : vector<8x128xf32>
    %15 = math.exp %14 : vector<8x128xf32>
    %cst_10 = arith.constant dense<0.000000e+00> : vector<8xf32>
    %16 = vector.multi_reduction <add>, %15, %cst_10 [1] : vector<8x128xf32> to vector<8xf32>
    %17 = vector.shape_cast %16 : vector<8xf32> to vector<8x1xf32>
    %18 = vector.broadcast %17 : vector<8x1xf32> to vector<8x128xf32>
    %19 = arith.divf %15, %18 : vector<8x128xf32>
    %c0_11 = arith.constant 0 : index
    %c0_12 = arith.constant 0 : index
    %20 = vector.load %arg5[%c0_11, %c0_12] : memref<8x128xf32, #tpu.memory_space<vmem>>, vector<8x128xf32>
    tpu.vector_store %arg5[%c0_11, %c0_12], %19 {strides = array<i32>} : memref<8x128xf32, #tpu.memory_space<vmem>>, vector<8x128xf32>,
    return
  }
  func.func @transform_0(%arg0: i32) -> (i32, i32) {
    %c0_i32 = arith.constant 0 : i32
    %c0_i32_0 = arith.constant 0 : i32
    return %arg0, %c0_i32 : i32, i32
  }
  func.func @transform_1(%arg0: i32) -> (i32, i32) {
    %c0_i32 = arith.constant 0 : i32
    %c0_i32_0 = arith.constant 0 : i32
    %c0_i32_1 = arith.constant 0 : i32
    return %c0_i32, %c0_i32_0 : i32, i32
  }
  func.func @transform_2(%arg0: i32) -> (i32, i32) {
    %c0_i32 = arith.constant 0 : i32
    %c0_i32_0 = arith.constant 0 : i32
    %c0_i32_1 = arith.constant 0 : i32
    return %c0_i32, %c0_i32_0 : i32, i32
  }
  func.func @transform_3(%arg0: i32) -> (i32, i32) {
    %c0_i32 = arith.constant 0 : i32
    %c0_i32_0 = arith.constant 0 : i32
    %c0_i32_1 = arith.constant 0 : i32
    return %c0_i32, %c0_i32_0 : i32, i32
  }
  func.func @transform_4(%arg0: i32) -> (i32, i32) {
    %c0_i32 = arith.constant 0 : i32
    %c0_i32_0 = arith.constant 0 : i32
    return %arg0, %c0_i32 : i32, i32
  }
}

</mosaic_0001>

<bundles_post_ra>
// kernel: tpu_custom_call.1
= control target key start
LH: loop header
LB: loop body
LE: loop exit
PB: predicated region body
PF: predicated region fallthrough
CT: control target
= control target key end

     0   :  { %9 = vsyncpa [#allocation3], 0  ;;  %s516_s0 = inlined_call_operand.hbm [shape: bf16[8,24], index: 0, kind: input, shape index: {}]   ;;  %s517_s1 = inlined_call_operand.hbm [shape: bf16[24,128], index: 1, kind: input, shape index: {}]   ;;  %s518_s2 = inlined_call_operand.hbm [shape: bf16[128,128], index: 2, kind: input, shape index: {}]   ;;  %s519_s3 = inlined_call_operand.vmem [shape: f32[1,128], index: 3, kind: input, shape index: {}]   ;;  %s520_s4 = inlined_call_operand.hbm [shape: f32[8,128], index: 4, kind: output, shape index: {}]  }
   0x1   :  { %10 = vsyncpa [#allocation6], 0 }
   0x2   :  { %11 = vsyncpa [#allocation4], 0  ;;  %s426_s15 = smov [#allocation5]   ;;  %s332_s19 = scalar_lea.hbm %s517_s1, 192 }
   0x3   :  { %s27_s16 = sshll.u32 %s426_s15, 4  ;;  %p333_p0 = scmp.ne.s32.totalorder %s517_s1, %s332_s19  ;;  %s28_s16 = int_to_ptr.vmem [resolvable:$true] %s27_s16 }
   0x4   :  { %p336_p1 = scmp.lt.u32.totalorder %s332_s19, %s517_s1 }
   0x6   :  { %p338_p2 = pnand %p336_p1, %p333_p0 }
   0x8   :  { %341 = shalt.err (!%p338_p2)
}
   0x9   :  { %s342_s24 = scalar_lea.vmem %s28_s16, 192  ;;  %p347_p4 = scmp.lt.s32.totalorder %s28_s16, %s28_s16 }
   0xa   :  { %p343_p3 = scmp.ne.s32.totalorder %s28_s16, %s342_s24  ;;  %p348_p5 = scmp.lt.s32.totalorder %s342_s24, %s342_s24 }
   0xc   :  { %p349_p6 = por %p348_p5, %p347_p4 }
   0xe   :  { %p350_p7 = pnand %p349_p6, %p343_p3 }
  0x10   :  { %353 = shalt.err (!%p350_p7)
}
  0x11   :  { %s427_s25 = smov 64   ;;  %s428_s26 = smov 4  }
  0x12   :  { %33 = dma.hbm_to_vmem [thread:$0]  %s517_s1, 192, %s28_s16, [#allocation6], %s427_s25, %s427_s25, %s428_s26  }
  0x13   :  { %s429_s29 = smov [#allocation2]   ;;  %s430_s5 = smov [#allocation7]  }
  0x14   :  { %s18_s30 = sshll.u32 %s429_s29, 4  ;;  %s39_s6 = sshll.u32 %s430_s5, 4  ;;  %s19_s30 = int_to_ptr.vmem [resolvable:$true] %s18_s30  ;;  %s40_s6 = int_to_ptr.vmem [resolvable:$true] %s39_s6 }
  0x15   :  { %s354_s9 = scalar_lea.hbm %s516_s0, 64 }
  0x16   :  { %p355_p8 = scmp.ne.s32.totalorder %s516_s0, %s354_s9  ;;  %p358_p9 = scmp.lt.u32.totalorder %s354_s9, %s516_s0 }
  0x18   :  { %p360_p10 = pnand %p358_p9, %p355_p8 }
  0x1a   :  { %363 = shalt.err (!%p360_p10)
}
  0x1b   :  { %s364_s1 = scalar_lea.vmem %s19_s30, 64  ;;  %p369_p12 = scmp.lt.s32.totalorder %s19_s30, %s19_s30 }
  0x1c   :  { %p365_p11 = scmp.ne.s32.totalorder %s19_s30, %s364_s1  ;;  %p370_p13 = scmp.lt.s32.totalorder %s364_s1, %s364_s1 }
  0x1e   :  { %p371_p0 = por %p370_p13, %p369_p12 }
  0x20   :  { %p372_p1 = pnand %p371_p0, %p365_p11 }
  0x22   :  { %375 = shalt.err (!%p372_p1)
}
  0x23   :  { %21 = dma.hbm_to_vmem [thread:$0]  %s516_s0, 64, %s19_s30, [#allocation3]  }
  0x24   :  { %s376_s18 = scalar_lea.hbm %s518_s2, 1024 }
  0x25   :  { %p377_p2 = scmp.ne.s32.totalorder %s518_s2, %s376_s18  ;;  %p380_p3 = scmp.lt.u32.totalorder %s376_s18, %s518_s2 }
  0x27   :  { %p382_p4 = pnand %p380_p3, %p377_p2 }
  0x29   :  { %385 = shalt.err (!%p382_p4)
}
  0x2a   :  { %s386_s23 = scalar_lea.vmem %s40_s6, 1024  ;;  %p391_p6 = scmp.lt.s32.totalorder %s40_s6, %s40_s6 }
  0x2b   :  { %p387_p5 = scmp.ne.s32.totalorder %s40_s6, %s386_s23  ;;  %p392_p7 = scmp.lt.s32.totalorder %s386_s23, %s386_s23 }
  0x2d   :  { %p393_p8 = por %p392_p7, %p391_p6 }
  0x2f   :  { %p394_p9 = pnand %p393_p8, %p387_p5 }
  0x31   :  { %397 = shalt.err (!%p394_p9)
}
  0x32   :  { %45 = dma.hbm_to_vmem [thread:$0]  %s518_s2, 1024, %s40_s6, [#allocation6], %s427_s25, %s427_s25, %s428_s26  }
  0x33   :  { %420 = dma.done.wait [#allocation3], 64  }
  0x34   :  { %421 = vsyncadd [#allocation3], 4294967232 }
  0x35   :  { %422 = dma.done.wait [#allocation6], 1216  }
  0x36   :  { %423 = vsyncadd [#allocation6], 4294966080  ;;  %v431_v0 = vmov 0.0   ;;  %vm432_vm0 = vmmov 0   ;;  %v318_v1 = vld [vmem:[#allocation5] sm:$0xff]   ;;  %vm75_vm1 = vcmask 1043456  }
  0x37   :  { %282 = vmatprep.subr.bf16.mxu0 %v431_v0  ;;  %286 = vmatprep.mubr.msk.bf16.mxu0 %vm432_vm0, %v431_v0  ;;  %v319_v2 = vld [vmem:[#allocation5 + $0x8] ss:$0 sps:$4 sm:$0xff]   ;;  %v320_v3 = vld [vmem:[#allocation7] sm:$0xff]   ;;  %v321_v5 = vld [vmem:[#allocation7 + $0x8] sm:$0xff]   ;;  %vm71_vm2 = vcmask 195584   ;;  %s433_s26 = smov [#allocation8]  }
  0x38   :  { %290 = vmatprep.subr.bf16.mxu1 %v431_v0  ;;  %306 = vmatprep.mubr.msk.bf16.mxu1 %vm432_vm0, %v431_v0  ;;  %v77_v4 = vsel %vm75_vm1, %v319_v2, 0  ;;  %v58_v6 = vld [vmem:[#allocation2] sm:$0xf]  ;;  %v323_v8 = vld [vmem:[#allocation7 + $0x18] sm:$0xff]   ;;  %v324_v9 = vld [vmem:[#allocation7 + $0x20] sm:$0xff]   ;;  %s248_s27 = sshll.u32 %s433_s26, 4  ;;  %s249_s27 = int_to_ptr.vmem [resolvable:$true] %s248_s27 }
  0x39   :  { %283 = vmatpush3.bf16.msra.mxu0 %v318_v1  ;;  %291 = vmatpush3.bf16.msra.mxu1 %v320_v3  ;;  %v322_v7 = vld [vmem:[#allocation7 + $0x10] sm:$0xff]   ;;  %v325_v10 = vld [vmem:[#allocation7 + $0x28] sm:$0xff]   ;;  %v327_v12 = vld [vmem:[#allocation7 + $0x38] sm:$0xff]   ;;  %p403_p11 = scmp.lt.s32.totalorder %s249_s27, %s249_s27 }
  0x3a   :  { %284 = vmatprep.subr.bf16.mxu0 %v431_v0  ;;  %292 = vmatprep.subr.bf16.mxu1 %v431_v0  ;;  %v326_v11 = vld [vmem:[#allocation7 + $0x30] sm:$0xff]  }
  0x3b   :  { %v261_v19 = vld [vmem:[%s519_s3] ss:$0 sm:$0xff]  ;;  %s398_s3 = scalar_lea.vmem %s249_s27, 128 }
  0x3c   :  { %p399_p10 = scmp.ne.s32.totalorder %s249_s27, %s398_s3  ;;  %p404_p12 = scmp.lt.s32.totalorder %s398_s3, %s398_s3 }
  0x3d   :  { %285 = vmatpush3.bf16.msra.mxu0 %v77_v4  ;;  %293 = vmatpush3.bf16.msra.mxu1 %v321_v5 }
  0x3e   :  { %294 = vmatprep.subr.bf16.mxu1 %v431_v0  ;;  %p405_p13 = por %p404_p12, %p403_p11 }
  0x40   :  { %287 = vmatmul.mubr.msk.bf16.vlgmr.msra.gmra.mrb[0].mxu0 %vm71_vm2, %v58_v6  ;;  %p406_p0 = pnand %p405_p13, %p399_p10 }
  0x41   :  { %295 = vmatpush3.bf16.msra.mxu1 %v322_v7 }
  0x42   :  { %296 = vmatprep.subr.bf16.mxu1 %v431_v0 }
  0x45   :  { %297 = vmatpush3.bf16.msra.mxu1 %v323_v8 }
  0x46   :  { %298 = vmatprep.subr.bf16.mxu1 %v431_v0 }
  0x49   :  { %299 = vmatpush3.bf16.msra.mxu1 %v324_v9 }
  0x4a   :  { %300 = vmatprep.subr.bf16.mxu1 %v431_v0 }
  0x4d   :  { %301 = vmatpush3.bf16.msra.mxu1 %v325_v10 }
  0x4e   :  { %302 = vmatprep.subr.bf16.mxu1 %v431_v0 }
  0x51   :  { %303 = vmatpush3.bf16.msra.mxu1 %v326_v11 }
  0x52   :  { %304 = vmatprep.subr.bf16.mxu1 %v431_v0 }
  0x55   :  { %305 = vmatpush3.bf16.msra.mxu1 %v327_v12 }
 0x113   :  { %v113_v13 = vpop.f32.mrb[0].mxu0 }
 0x114   :  { %v119_v14 = vmax.f32 %v113_v13, 0.0  ;;  %v288_v15 = vpop.f32.mrb[1].mxu0 }
 0x115   :  { %v116_v16 = vpop.f32.mrb[2].mxu0 }
 0x116   :  { %v120_v17 = vpack.c.bf16 %v119_v14, %v119_v14  ;;  %v289_v18 = vpop.f32.mrb[3].mxu0 }
 0x118   :  { %307 = vmatmul.mubr.bf16.vlgmr.msra.gmra.mrb[0].mxu1 %v120_v17 }
 0x1eb   :  { %v226_v20 = vpop.f32.mrb[0].mxu1 }
 0x1ec   :  { %v227_v21 = vadd.f32 %v261_v19, %v226_v20  ;;  %v308_v22 = vpop.f32.mrb[1].mxu1 }
 0x1ed   :  { %v229_v23 = vpop.f32.mrb[2].mxu1 }
 0x1ee   :  { %232 = vmax.xlane.f32.xlu0 %v227_v21  ;;  %v309_v24 = vpop.f32.mrb[3].mxu1 }
 0x27b   :  { %v233_v25 = vpop.xlane.xlu0 %232 }
 0x27c   :  { %v234_v26 = vsub.f32 %v227_v21, %v233_v25 }
 0x27e   :  { %v235_v27 = vmul.f32 1.442695, %v234_v26 }
 0x280   :  { %328 = vpow2.f32 %v235_v27 }
 0x28a   :  { %v329_v28 = vpop.eup %328 }
 0x28b   :  { %237 = vadd.xlane.f32.xlu0 %v329_v28 }
 0x318   :  { %v238_v29 = vpop.xlane.xlu0 %237 }
 0x319   :  { %330 = vrcp.f32 %v238_v29 }
 0x323   :  { %v331_v30 = vpop.eup %330 }
 0x324   :  { %v240_v31 = vmul.f32 %v331_v30, %v329_v28 }
 0x326   :  { %241 = vst [vmem:[#allocation8] sm:$0xff] %v240_v31 }
 0x327   :  { %409 = shalt.err (!%p406_p0)
}
 0x328   :  { %s410_s30 = scalar_lea.hbm %s520_s4, 128 }
 0x329   :  { %p411_p1 = scmp.ne.s32.totalorder %s520_s4, %s410_s30  ;;  %p414_p2 = scmp.lt.u32.totalorder %s410_s30, %s520_s4 }
 0x32b   :  { %p416_p3 = pnand %p414_p2, %p411_p1 }
 0x32d   :  { %419 = shalt.err (!%p416_p3)
}
 0x32e   :  { %251 = dma.vmem_to_hbm [thread:$0]  %s249_s27, 128, %s520_s4, [#allocation4]  }
 0x32f   :  { %424 = dma.done.wait [#allocation4], 128  }
 0x330   :  { %425 = vsyncadd [#allocation4], 4294967168 }
 0x331   :  { %255 = vsyncpa [#allocation3], 1 }
 0x332   :  { %256 = vsyncpa [#allocation6], 1 }
 0x333   :  { %257 = vsyncpa [#allocation4], 1 }

</bundles_post_ra>
